<compile_context>
chip_gen: v7x
topology: tpu7x:2x2x1
jax: 0.10.0
libtpu: 0.0.40
codegen_flags: <defaults>
</compile_context>

<pallas_src>
import functools

import jax
import jax.numpy as jnp
from jax.experimental import pallas as pl
from jax.experimental.pallas import tpu as pltpu


_MIN_GRID = 2  # aim for >=2 grid steps on "parallel" axes (v7x has 2 TensorCores/chip)


def _round_up(v, m):
    return ((v + m - 1) // m) * m


def _round_down(v, m):
    return max(m, (v // m) * m)


def _sublane_multiple(dtype):
    # native sublane tile height: 8 for 4-byte, 16 for 2-byte, 32 for 1-byte dtypes
    return max(8, 32 // jnp.dtype(dtype).itemsize)


def _chip_budgets():
    """(target block bytes, scoped VMEM limit) derived from the chip's VMEM capacity."""
    cap = None
    try:
        cap = getattr(pltpu.get_tpu_info(), "vmem_capacity_bytes", None)
    except Exception:
        cap = None
    if cap is not None and cap >= 96 * 1024 * 1024:   # v5e / v6e: 128 MiB per TC
        return 8 * 1024 * 1024, 64 * 1024 * 1024
    # conservative default / v7x: 64 MiB per TC
    return 4 * 1024 * 1024, 40 * 1024 * 1024


_TARGET_BLOCK_BYTES, _VMEM_LIMIT_BYTES = _chip_budgets()


# --------------------------------------------------------------------------------------
# Tile-size helpers (budget with physical tile padding, dtype-aware sublane rounding)
# --------------------------------------------------------------------------------------
def _row_tile(n_rows, padded_row_bytes, sub):
    """Rows per block: ~target padded bytes, multiple of the native sublane count,
    and small enough that the grid gets >= _MIN_GRID steps when possible."""
    target = max(1, _TARGET_BLOCK_BYTES // max(1, padded_row_bytes))
    cap = _round_up(pl.cdiv(n_rows, _MIN_GRID), sub)
    tr = min(target, cap)
    if tr >= n_rows:
        return n_rows
    return min(n_rows, _round_down(tr, sub))


def _lane_tile(n_lanes, padded_col_bytes):
    """Lanes per block: ~target padded bytes, multiple of 128 lanes (or full extent)."""
    target = max(1, _TARGET_BLOCK_BYTES // max(1, padded_col_bytes))
    cap = _round_up(pl.cdiv(n_lanes, _MIN_GRID), 128)
    tn = min(target, cap)
    if tn >= n_lanes:
        return n_lanes
    return min(n_lanes, _round_down(tn, 128))


# --------------------------------------------------------------------------------------
# Kernels
# --------------------------------------------------------------------------------------
def _ln_reduce_kernel(x_ref, w_ref, b_ref, o_ref, *, eps, inv_dim, axis):
    """Two-pass LayerNorm over `axis` of the block; f32 stats, fused affine."""
    x = x_ref[...].astype(jnp.float32)
    mean = jnp.sum(x, axis=axis, keepdims=True) * inv_dim
    d = x - mean
    var = jnp.sum(d * d, axis=axis, keepdims=True) * inv_dim
    inv = jax.lax.rsqrt(var + eps)
    o_ref[...] = (d * inv * w_ref[...] + b_ref[...]).astype(o_ref.dtype)


def _ln_packed_kernel(x_ref, w_ref, b_ref, g_ref, o_ref, *, eps):
    """channels_last with small power-of-two C: each 128-wide lane row of the (tr, 128)
    tile holds 128//C complete normalization groups of C contiguous channels.
    Per-group means/variances come from MXU matmuls against `g`, a constant 128x128
    block-diagonal matrix with entries 1/C (the MXU is otherwise idle, keeping the
    VPU/XLU free so the kernel stays HBM-bound even at v7x bandwidth).
    The first moment uses an exact hi/lo split so the group mean is f32-exact even if
    the MXU multiplies f32 inputs in bf16 passes."""
    x = x_ref[...].astype(jnp.float32)
    g = g_ref[...]                                    # (128, 128), block-diagonal, 1/C
    x_hi = x.astype(jnp.bfloat16).astype(jnp.float32)
    x_lo = x - x_hi
    mean = (jnp.dot(x_hi, g, preferred_element_type=jnp.float32)
            + jnp.dot(x_lo, g, preferred_element_type=jnp.float32))
    d = x - mean
    var = jnp.dot(d * d, g, preferred_element_type=jnp.float32)
    inv = jax.lax.rsqrt(var + eps)
    o_ref[...] = (d * inv * w_ref[...] + b_ref[...]).astype(o_ref.dtype)


# --------------------------------------------------------------------------------------
# Wrappers
# --------------------------------------------------------------------------------------
def _layer_norm_lane(x2d, w, b, eps):
    """channels_last, C on the lane axis (used for C >= 128 or non-power-of-two C)."""
    R, C = x2d.shape
    sub = _sublane_multiple(x2d.dtype)
    padded_row_bytes = _round_up(C, 128) * x2d.dtype.itemsize   # lane-padded tile row
    tr = _row_tile(R, padded_row_bytes, sub)
    return pl.pallas_call(
        functools.partial(_ln_reduce_kernel, eps=float(eps), inv_dim=1.0 / C, axis=-1),
        out_shape=jax.ShapeDtypeStruct((R, C), x2d.dtype),
        grid_spec=pltpu.PrefetchScalarGridSpec(
            num_scalar_prefetch=0,
            grid=(pl.cdiv(R, tr),),
            in_specs=[
                pl.BlockSpec((tr, C), lambda i: (i, 0)),
                pl.BlockSpec((1, C), lambda i: (0, 0)),
                pl.BlockSpec((1, C), lambda i: (0, 0)),
            ],
            out_specs=pl.BlockSpec((tr, C), lambda i: (i, 0)),
        ),
        compiler_params=pltpu.CompilerParams(
            dimension_semantics=("parallel",),
            vmem_limit_bytes=_VMEM_LIMIT_BYTES),
    )(x2d, w.reshape(1, C), b.reshape(1, C))


def _layer_norm_packed(x_flat, C, w, b, eps):
    """channels_last, power-of-two C <= 64; x_flat length is a multiple of 128."""
    L = 128
    k = L // C
    Rk = x_flat.shape[0] // L
    xp = x_flat.reshape(Rk, L)                       # free reshape (row-major)
    wp = jnp.tile(w, k).reshape(1, L)
    bp = jnp.tile(b, k).reshape(1, L)
    lane = jnp.arange(L, dtype=jnp.int32)
    g = ((lane[:, None] // C) == (lane[None, :] // C)).astype(jnp.float32) * (1.0 / C)
    sub = _sublane_multiple(x_flat.dtype)
    tr = _row_tile(Rk, L * x_flat.dtype.itemsize, sub)
    out = pl.pallas_call(
        functools.partial(_ln_packed_kernel, eps=float(eps)),
        out_shape=jax.ShapeDtypeStruct((Rk, L), x_flat.dtype),
        grid_spec=pltpu.PrefetchScalarGridSpec(
            num_scalar_prefetch=0,
            grid=(pl.cdiv(Rk, tr),),
            in_specs=[
                pl.BlockSpec((tr, L), lambda i: (i, 0)),
                pl.BlockSpec((1, L), lambda i: (0, 0)),
                pl.BlockSpec((1, L), lambda i: (0, 0)),
                pl.BlockSpec((L, L), lambda i: (0, 0)),
            ],
            out_specs=pl.BlockSpec((tr, L), lambda i: (i, 0)),
        ),
        compiler_params=pltpu.CompilerParams(
            dimension_semantics=("parallel",),
            vmem_limit_bytes=_VMEM_LIMIT_BYTES),
    )(xp, wp, bp, g)
    return out.reshape(-1)


def _layer_norm_channels_first(x, w, b, eps):
    B, C, H, W = x.shape
    HW = H * W
    itemsize = x.dtype.itemsize
    sub = _sublane_multiple(x.dtype)

    # Preferred layout: (B, C, HW/128, 128) -> spatial on (sublane, lane), C on a
    # non-minor axis (no sublane padding for small C; channel reduce = VPU adds).
    min_4d_block = C * sub * 128 * itemsize
    if HW % 128 == 0 and min_4d_block <= _TARGET_BLOCK_BYTES:
        S = HW // 128
        x4 = x.reshape(B, C, S, 128)                 # free reshape
        ts = _row_tile(S, C * 128 * itemsize, sub)
        block_bytes = C * _round_up(ts, sub) * 128 * itemsize
        bb = max(1, min(B, _TARGET_BLOCK_BYTES // max(1, block_bytes)))
        if pl.cdiv(B, bb) * pl.cdiv(S, ts) < _MIN_GRID and B > 1:
            bb = pl.cdiv(B, _MIN_GRID)
        out = pl.pallas_call(
            functools.partial(_ln_reduce_kernel, eps=float(eps), inv_dim=1.0 / C, axis=1),
            out_shape=jax.ShapeDtypeStruct((B, C, S, 128), x.dtype),
            grid_spec=pltpu.PrefetchScalarGridSpec(
                num_scalar_prefetch=0,
                grid=(pl.cdiv(B, bb), pl.cdiv(S, ts)),
                in_specs=[
                    pl.BlockSpec((bb, C, ts, 128), lambda i, j: (i, 0, j, 0)),
                    pl.BlockSpec((1, C, 1, 1), lambda i, j: (0, 0, 0, 0)),
                    pl.BlockSpec((1, C, 1, 1), lambda i, j: (0, 0, 0, 0)),
                ],
                out_specs=pl.BlockSpec((bb, C, ts, 128), lambda i, j: (i, 0, j, 0)),
            ),
            compiler_params=pltpu.CompilerParams(
                dimension_semantics=("parallel", "parallel"),
                vmem_limit_bytes=_VMEM_LIMIT_BYTES),
        )(x4, w.reshape(1, C, 1, 1), b.reshape(1, C, 1, 1))
        return out.reshape(B, C, H, W)

    # Fallback (HW not a multiple of 128, or very large C): channels on sublanes.
    x3 = x.reshape(B, C, HW)
    tn = _lane_tile(HW, _round_up(C, sub) * itemsize)
    block_bytes = _round_up(C, sub) * _round_up(tn, 128) * itemsize
    bb = max(1, min(B, _TARGET_BLOCK_BYTES // max(1, block_bytes)))
    if pl.cdiv(B, bb) * pl.cdiv(HW, tn) < _MIN_GRID and B > 1:
        bb = pl.cdiv(B, _MIN_GRID)
    out = pl.pallas_call(
        functools.partial(_ln_reduce_kernel, eps=float(eps), inv_dim=1.0 / C, axis=1),
        out_shape=jax.ShapeDtypeStruct((B, C, HW), x.dtype),
        grid_spec=pltpu.PrefetchScalarGridSpec(
            num_scalar_prefetch=0,
            grid=(pl.cdiv(B, bb), pl.cdiv(HW, tn)),
            in_specs=[
                pl.BlockSpec((bb, C, tn), lambda i, j: (i, 0, j)),
                pl.BlockSpec((1, C, 1), lambda i, j: (0, 0, 0)),
                pl.BlockSpec((1, C, 1), lambda i, j: (0, 0, 0)),
            ],
            out_specs=pl.BlockSpec((bb, C, tn), lambda i, j: (i, 0, j)),
        ),
        compiler_params=pltpu.CompilerParams(
            dimension_semantics=("parallel", "parallel"),
            vmem_limit_bytes=_VMEM_LIMIT_BYTES),
    )(x3, w.reshape(1, C, 1), b.reshape(1, C, 1))
    return out.reshape(B, C, H, W)


def layer_norm(x, weight, bias, eps=1e-6, data_format="channels_last"):
    weight = jnp.asarray(weight).astype(jnp.float32)
    bias = jnp.asarray(bias).astype(jnp.float32)
    if data_format == "channels_last":
        C = x.shape[-1]
        assert weight.shape == (C,) and bias.shape == (C,)
        if C <= 64 and (C & (C - 1)) == 0:
            # Small power-of-two C: always take the lane-packed path.  If the flat
            # length is not a multiple of 128, pad by < 128 elements (rows normalize
            # independently) instead of falling back to a lane-sparse kernel.
            total = x.size
            padded = _round_up(total, 128)
            flat = x.reshape(-1)
            if padded != total:
                flat = jnp.pad(flat, (0, padded - total))
            out = _layer_norm_packed(flat, C, weight, bias, eps)
            if padded != total:
                out = out[:total]
            return out.reshape(x.shape)
        return _layer_norm_lane(x.reshape(-1, C), weight, bias, eps).reshape(x.shape)
    elif data_format == "channels_first":
        assert x.ndim == 4
        C = x.shape[1]
        assert weight.shape == (C,) and bias.shape == (C,)
        return _layer_norm_channels_first(x, weight, bias, eps)
    else:
        raise ValueError(f"not support data format '{data_format}'")


# --------------------------------------------------------------------------------------
# Reference + self-test
# --------------------------------------------------------------------------------------
def _reference_layer_norm(x, weight, bias, eps, data_format):
    x = x.astype(jnp.float32)
    if data_format == "channels_last":
        mean = jnp.mean(x, axis=-1, keepdims=True)
        var = jnp.mean((x - mean) ** 2, axis=-1, keepdims=True)
        return (x - mean) / jnp.sqrt(var + eps) * weight + bias
    mean = jnp.mean(x, axis=1, keepdims=True)
    var = jnp.mean((x - mean) ** 2, axis=1, keepdims=True)
    y = (x - mean) / jnp.sqrt(var + eps)
    return weight[None, :, None, None] * y + bias[None, :, None, None]


if __name__ == "__main__":
    key = jax.random.PRNGKey(0)
    ks = jax.random.split(key, 8)
    eps = 1e-6

    def run_case(idx, shape, data_format, atol):
        C = shape[1] if data_format == "channels_first" else shape[-1]
        kx, kw, kb = jax.random.split(ks[idx], 3)
        x = jax.random.normal(kx, shape, jnp.float32)
        w = 1.0 + 0.1 * jax.random.normal(kw, (C,), jnp.float32)
        b = 0.1 * jax.random.normal(kb, (C,), jnp.float32)
        out = jax.block_until_ready(layer_norm(x, w, b, eps, data_format))
        ref = _reference_layer_norm(x, w, b, eps, data_format)
        assert out.shape == x.shape
        err = float(jnp.max(jnp.abs(out - ref)))
        assert err < atol, (shape, data_format, err)

    # channels_first, spec shape NCHW (2,4,16,16): HW%128==0 -> 4D lane-dense kernel
    run_case(0, (2, 4, 16, 16), "channels_first", 1e-4)
    # channels_first, HW%128!=0 -> (B,C,HW) sublane-reduce fallback
    run_case(1, (2, 4, 10, 10), "channels_first", 1e-4)
    # channels_last, C=4 -> packed kernel (32 groups per 128-lane row), no padding
    run_case(2, (2, 16, 16, 4), "channels_last", 5e-3)
    # channels_last, C=4 with R % (128/C) != 0 -> packed kernel with tiny flat pad
    run_case(3, (3, 5, 7, 4), "channels_last", 5e-3)
    # channels_last, C=64 -> packed kernel (2 groups per 128-lane row)
    run_case(4, (2, 4, 4, 64), "channels_last", 5e-3)
    # channels_last, C=128 -> plain lane-dense row kernel
    run_case(5, (2, 8, 8, 128), "channels_last", 1e-4)

    print("KERNEL_OK")
</pallas_src>

<mosaic_0001>
module attributes {stable_mosaic.version = 11 : i64} {
  func.func @_ln_reduce_kernel(%arg0: i32, %arg1: i32, %arg2: memref<1x4x2x128xf32, #tpu.memory_space<vmem>>, %arg3: memref<1x4x1x1xf32, #tpu.memory_space<vmem>>, %arg4: memref<1x4x1x1xf32, #tpu.memory_space<vmem>>, %arg5: memref<1x4x2x128xf32, #tpu.memory_space<vmem>>) attributes {dimension_semantics = [#tpu.dimension_semantics<parallel>, #tpu.dimension_semantics<parallel>], iteration_bounds = array<i64: 2, 1>, scalar_prefetch = 0 : i64, scratch_operands = 0 : i64, tpu.core_type = #tpu.core_type<tc>, window_params = [{transform_indices = @transform_0, window_bounds = array<i64: 1, 4, 2, 128>}, {pipeline_mode = #tpu.pipeline_mode<synchronous>, transform_indices = @transform_1, window_bounds = array<i64: 1, 4, 1, 1>}, {pipeline_mode = #tpu.pipeline_mode<synchronous>, transform_indices = @transform_2, window_bounds = array<i64: 1, 4, 1, 1>}, {transform_indices = @transform_3, window_bounds = array<i64: 1, 4, 2, 128>}]} {
    %c0 = arith.constant 0 : index
    %c0_0 = arith.constant 0 : index
    %c0_1 = arith.constant 0 : index
    %c0_2 = arith.constant 0 : index
    %0 = vector.load %arg2[%c0, %c0_0, %c0_1, %c0_2] : memref<1x4x2x128xf32, #tpu.memory_space<vmem>>, vector<1x4x2x128xf32>
    %cst = arith.constant dense<0.000000e+00> : vector<1x2x128xf32>
    %1 = vector.multi_reduction <add>, %0, %cst [1] : vector<1x4x2x128xf32> to vector<1x2x128xf32>
    %2 = vector.shape_cast %1 : vector<1x2x128xf32> to vector<1x1x2x128xf32>
    %cst_3 = arith.constant 2.500000e-01 : f32
    %3 = vector.broadcast %cst_3 : f32 to vector<1x1x2x128xf32>
    %4 = arith.mulf %2, %3 : vector<1x1x2x128xf32>
    %5 = vector.broadcast %4 : vector<1x1x2x128xf32> to vector<1x4x2x128xf32>
    %6 = arith.subf %0, %5 : vector<1x4x2x128xf32>
    %7 = arith.mulf %6, %6 : vector<1x4x2x128xf32>
    %cst_4 = arith.constant dense<0.000000e+00> : vector<1x2x128xf32>
    %8 = vector.multi_reduction <add>, %7, %cst_4 [1] : vector<1x4x2x128xf32> to vector<1x2x128xf32>
    %9 = vector.shape_cast %8 : vector<1x2x128xf32> to vector<1x1x2x128xf32>
    %cst_5 = arith.constant 2.500000e-01 : f32
    %10 = vector.broadcast %cst_5 : f32 to vector<1x1x2x128xf32>
    %11 = arith.mulf %9, %10 : vector<1x1x2x128xf32>
    %cst_6 = arith.constant 9.99999997E-7 : f32
    %12 = vector.broadcast %cst_6 : f32 to vector<1x1x2x128xf32>
    %13 = arith.addf %11, %12 : vector<1x1x2x128xf32>
    %14 = math.rsqrt %13 : vector<1x1x2x128xf32>
    %15 = vector.broadcast %14 : vector<1x1x2x128xf32> to vector<1x4x2x128xf32>
    %16 = arith.mulf %6, %15 : vector<1x4x2x128xf32>
    %c0_7 = arith.constant 0 : index
    %c0_8 = arith.constant 0 : index
    %c0_9 = arith.constant 0 : index
    %c0_10 = arith.constant 0 : index
    %17 = vector.load %arg3[%c0_7, %c0_8, %c0_9, %c0_10] : memref<1x4x1x1xf32, #tpu.memory_space<vmem>>, vector<1x4x1x1xf32>
    %18 = vector.broadcast %17 : vector<1x4x1x1xf32> to vector<1x4x2x128xf32>
    %19 = arith.mulf %16, %18 : vector<1x4x2x128xf32>
    %c0_11 = arith.constant 0 : index
    %c0_12 = arith.constant 0 : index
    %c0_13 = arith.constant 0 : index
    %c0_14 = arith.constant 0 : index
    %20 = vector.load %arg4[%c0_11, %c0_12, %c0_13, %c0_14] : memref<1x4x1x1xf32, #tpu.memory_space<vmem>>, vector<1x4x1x1xf32>
    %21 = vector.broadcast %20 : vector<1x4x1x1xf32> to vector<1x4x2x128xf32>
    %22 = arith.addf %19, %21 : vector<1x4x2x128xf32>
    %c0_15 = arith.constant 0 : index
    %c0_16 = arith.constant 0 : index
    %c0_17 = arith.constant 0 : index
    %c0_18 = arith.constant 0 : index
    %23 = vector.load %arg5[%c0_15, %c0_16, %c0_17, %c0_18] : memref<1x4x2x128xf32, #tpu.memory_space<vmem>>, vector<1x4x2x128xf32>
    tpu.vector_store %arg5[%c0_15, %c0_16, %c0_17, %c0_18], %22 {strides = array<i32>} : memref<1x4x2x128xf32, #tpu.memory_space<vmem>>, vector<1x4x2x128xf32>,
    return
  }
  func.func @transform_0(%arg0: i32, %arg1: i32) -> (i32, i32, i32, i32) {
    %c0_i32 = arith.constant 0 : i32
    %c0_i32_0 = arith.constant 0 : i32
    %c0_i32_1 = arith.constant 0 : i32
    return %arg0, %c0_i32, %arg1, %c0_i32_0 : i32, i32, i32, i32
  }
  func.func @transform_1(%arg0: i32, %arg1: i32) -> (i32, i32, i32, i32) {
    %c0_i32 = arith.constant 0 : i32
    %c0_i32_0 = arith.constant 0 : i32
    %c0_i32_1 = arith.constant 0 : i32
    %c0_i32_2 = arith.constant 0 : i32
    %c0_i32_3 = arith.constant 0 : i32
    return %c0_i32, %c0_i32_0, %c0_i32_1, %c0_i32_2 : i32, i32, i32, i32
  }
  func.func @transform_2(%arg0: i32, %arg1: i32) -> (i32, i32, i32, i32) {
    %c0_i32 = arith.constant 0 : i32
    %c0_i32_0 = arith.constant 0 : i32
    %c0_i32_1 = arith.constant 0 : i32
    %c0_i32_2 = arith.constant 0 : i32
    %c0_i32_3 = arith.constant 0 : i32
    return %c0_i32, %c0_i32_0, %c0_i32_1, %c0_i32_2 : i32, i32, i32, i32
  }
  func.func @transform_3(%arg0: i32, %arg1: i32) -> (i32, i32, i32, i32) {
    %c0_i32 = arith.constant 0 : i32
    %c0_i32_0 = arith.constant 0 : i32
    %c0_i32_1 = arith.constant 0 : i32
    return %arg0, %c0_i32, %arg1, %c0_i32_0 : i32, i32, i32, i32
  }
}

</mosaic_0001>

<bundles_post_ra>
// kernel: tpu_custom_call.1
= control target key start
LH: loop header
LB: loop body
LE: loop exit
PB: predicated region body
PF: predicated region fallthrough
CT: control target
= control target key end

     0   :  { %8 = vsyncpa [#allocation3], 0  ;;  %s881_s0 = inlined_call_operand.hbm [shape: f32[2,4,2,128], index: 0, kind: input, shape index: {}]   ;;  %s882_s1 = inlined_call_operand.vmem [shape: f32[1,4,1,1], index: 1, kind: input, shape index: {}]   ;;  %s883_s2 = inlined_call_operand.vmem [shape: f32[1,4,1,1], index: 2, kind: input, shape index: {}]   ;;  %s884_s3 = inlined_call_operand.hbm [shape: f32[2,4,2,128], index: 3, kind: output, shape index: {}]  }
   0x1   :  { %10 = vsyncpa [#allocation3 + $0x1], 0 }
   0x2   :  { %11 = vsyncpa [#allocation4], 0 }
   0x3   :  { %13 = vsyncpa [#allocation4 + $0x1], 0  ;;  %s670_s12 = smov 0   ;;  %s672_s13 = smov 0  }
   0x4   :  { %s674_s14 = smov 0   ;;  %s676_s15 = smov 0  }
   0x5   :  { %s678_s16 = smov 0   ;;  %s680_s17 = smov 0  }
   0x6 LB: > { %s433_s18 = sadd.s32 4294967295, %s641_s17   ;;  %s434_s19 = sadd.s32 4294967294, %s641_s17   ;;  %s641_s17 = sphi %s680_s17, %s19_s17   ;;  %s637_s16 = sphi %s678_s16, %s899_s16   ;;  %s633_s15 = sphi %s676_s15, %s898_s15   ;;  %s629_s14 = sphi %s674_s14, %s897_s14   ;;  %s625_s13 = sphi %s672_s13, %s896_s13   ;;  %s621_s12 = sphi %s670_s12, %s895_s12  }
   0x7   : > { %s31_s20 = sadd.s32 1, %s637_s16  ;;  %s40_s21 = sadd.s32 1, %s629_s14 }
   0x8   : > { %p33_p0 = scmp.ge.s32.totalorder %s31_s20, 2  ;;  %p47_p1 = scmp.ne.s32.totalorder %s629_s14, %s625_s13 }
   0x9   : > { %p48_p2 = scmp.eq.s32.totalorder %s641_s17, 0  ;;  %p53_p3 = scmp.ne.s32.totalorder %s625_s13, %s621_s12 }
   0xa   : > { %s901_s20 = smov (%p33_p0, %s31_s20), 0  ;;  %p54_p5 = scmp.eq.s32.totalorder %s433_s18, 0 }
   0xb   : > { %p711_p4 = por %p48_p2, %p47_p1  ;;  %s35_s23 = ssub.s32 %s637_s16, %s901_s20 }
   0xc   : > { %p121_p6 = scmp.eq.s32.totalorder %s433_s18, 1  ;;  %p38_p7 = scmp.eq.s32.totalorder %s35_s23, 0 }
   0xd   : > { %p717_p8 = por %p54_p5, %p53_p3  ;;  %p127_p10 = scmp.eq.s32.totalorder %s434_s19, 1 }
   0xe   : > { %p721_p9 = por %p121_p6, %p47_p1  ;;  %p470_p13 = scmp.lt.s32.totalorder %s641_s17, 2 }
   0xf   : > { %s726_s26 = scalar_select %p38_p7, %s629_s14, %s40_s21  }
  0x10   : > { %s888_s25 = scalar_select %p721_p9, 1, 0 }
  0x11   : > { %p728_p11 = por %p127_p10, %p53_p3  ;;  %s153_s28 = sand.u32 1, %s629_s14  }
  0x12   : > { %s437_s29 = sshll.u32 %s153_s28, 3  ;;  %s456_s30 = sshll.u32 %s637_s16, 7 }
  0x13   : > { %s889_s27 = scalar_select %p728_p11, 1, 0 }
  0x14   : > { %s739_s6 = scalar_lea.hbm %s881_s0, %s456_s30  ;;  %s157_s7 = scalar_lea.vmem [#allocation2], %s437_s29 }
  0x15   : > { %s165_s8 = sshll.u32 %s157_s7, 4  ;;  %p745_p0 = pnand %p470_p13, %p711_p4  ;;  %s741_s8 = int_to_ptr.vmem [resolvable:$true] %s165_s8 }
  0x16   : > { %s750_s10 = scalar_lea.sflag [#allocation3], %s153_s28  ;;  %s529_s11 = scalar_lea.hbm %s739_s6, 128 }
  0x17   : > { %p530_p2 = scmp.ne.s32.totalorder %s739_s6, %s529_s11  ;;  %p531_p3 = pneg %p745_p0 }
  0x18   : > { %s534_s21 = scalar_lea.hbm %s881_s0, 256  ;;  %p535_p4 = scmp.lt.u32.totalorder %s739_s6, %s881_s0 }
  0x19   : > { %p532_p5 = pnand %p531_p3, %p530_p2  ;;  %p536_p7 = scmp.lt.u32.totalorder %s534_s21, %s529_s11 }
  0x1a   : > { %p538_p13 = scmp.lt.u32.totalorder %s529_s11, %s739_s6 }
  0x1b   : > { %p533_p6 = pneg %p532_p5  ;;  %p537_p10 = por %p536_p7, %p535_p4 }
  0x1d   : > { %p539_p12 = por %p538_p13, %p537_p10 }
  0x1f   : > { %p540_p1 = pnand %p539_p12, %p533_p6 }
  0x21   : > { %543 = shalt.err (!%p540_p1)
}
  0x22   : > { %s544_s28 = scalar_lea.vmem %s741_s8, 128  ;;  %s643_s29 = smov [#allocation2]  }
  0x23   : > { %p545_p2 = scmp.ne.s32.totalorder %s741_s8, %s544_s28  ;;  %s549_s30 = sshll.u32 %s643_s29, 4  ;;  %s550_s30 = int_to_ptr.vmem [resolvable:$false] %s549_s30 }
  0x24   : > { %s551_s4 = scalar_lea.vmem %s550_s30, 256  ;;  %p552_p9 = scmp.lt.s32.totalorder %s741_s8, %s550_s30 }
  0x25   : > { %p547_p5 = pnand %p545_p2, %p531_p3  ;;  %p553_p4 = scmp.lt.s32.totalorder %s551_s4, %s544_s28 }
  0x27   : > { %p548_p11 = pneg %p547_p5  ;;  %p554_p7 = por %p553_p4, %p552_p9 }
  0x29   : > { %p555_p10 = pnand %p554_p7, %p548_p11 }
  0x2b   : > { %558 = shalt.err (!%p555_p10)
}
  0x2c   : > { %s644_s5 = smov 32   ;;  %s645_s7 = smov 2  }
  0x2d   : > { %465 = dma.hbm_to_vmem [thread:$0]  (!%p745_p0), %s739_s6, 128, %s741_s8, %s750_s10, %s644_s5, %s644_s5, %s645_s7  }
  0x2e   : > { %p173_p12 = scmp.lt.s32.totalorder %s641_s17, 3  ;;  %p891_p1 = scmp.ge.s32.totalorder %s641_s17, 1 }
  0x30   : > { %p174_p3 = pnand %p891_p1, %p173_p12 }
  0x31   : > { %s782_s11 = sand.u32 (!%p174_p3), 1, %s625_s13  }
  0x32   : > { %177 = sbr.rel (%p174_p3) target bundleno = 217 (0xd9), region = 32  ;;  %s441_s18 = sshll.u32 (!%p174_p3), %s782_s11, 3 }
  0x33   : > { %s180_s19 = scalar_lea.sflag (!%p174_p3), [#allocation3], %s782_s11  ;;  %s183_s21 = scalar_lea.vmem (!%p174_p3), [#allocation2], %s441_s18 }
  0x39   : > { %612 = dma.done.wait (%p717_p8), %s180_s19, 128  }
  0x3a   : > { %614 = vsyncadd (%p717_p8), %s180_s19, 4294967168  ;;  %v646_v0 = vmov 0   ;;  %v445_v1 = vld [vmem:[%s882_s1 + $0x2] ss:$0 sm:$0xff]  ;;  %v443_v2 = vld [vmem:[%s882_s1] ss:$0 sm:$0xff] }
  0x3b   : > { %526 = vset.pattern.permute.xlu1 %v646_v0  ;;  %525 = vset.pattern.permute.xlu0 %v646_v0  ;;  %v446_v3 = vld [vmem:[%s882_s1 + $0x3] ss:$0 sm:$0xff]  ;;  %v444_v4 = vld [vmem:[%s882_s1 + $0x1] ss:$0 sm:$0xff]  ;;  %v447_v6 = vld [vmem:[%s883_s2] ss:$0 sm:$0xff] }
  0x3c   : > { %274 = vperm.xlu1 %526, %v445_v1   ;;  %266 = vperm.xlu0 %525, %v443_v2   ;;  %v448_v5 = vld [vmem:[%s883_s2 + $0x1] ss:$0 sm:$0xff]  ;;  %v450_v7 = vld [vmem:[%s883_s2 + $0x3] ss:$0 sm:$0xff]  ;;  %v449_v8 = vld [vmem:[%s883_s2 + $0x2] ss:$0 sm:$0xff] }
  0x3d   : > { %vm210_vm0 = vcmask 1041408   ;;  %v206_v9 = vld [vmem:[%s183_s21] sm:$0x3]  ;;  %v207_v10 = vld [vmem:[%s183_s21 + $0x2] sm:$0x3]  ;;  %s457_s10 = sshll.u32 %s633_s15, 7 }
  0x3e   : > { %v211_v11 = vsel %vm210_vm0, %v206_v9, 0.0  ;;  %v212_v12 = vsel %vm210_vm0, %v207_v10, 0.0  ;;  %v208_v13 = vld [vmem:[%s183_s21 + $0x4] sm:$0x3]  ;;  %v209_v16 = vld [vmem:[%s183_s21 + $0x6] sm:$0x3]  ;;  %s832_s23 = scalar_lea.hbm %s884_s3, %s457_s10 }
  0x3f   : > { %v213_v14 = vadd.f32 %v212_v12, %v211_v11  ;;  %v214_v15 = vsel %vm210_vm0, %v208_v13, 0.0  ;;  %v216_v18 = vsel %vm210_vm0, %v209_v16, 0.0  ;;  %s205_s21 = scalar_lea.vmem [#allocation5], %s441_s18  ;;  %s334_s15 = scalar_lea.sflag [#allocation4], %s782_s11 }
  0x40   : > { %278 = vperm.xlu1 %526, %v446_v3   ;;  %270 = vperm.xlu0 %525, %v444_v4   ;;  %s348_s9 = sshll.u32 %s205_s21, 4  ;;  %p892_p9 = scmp.ne.s32.totalorder %s888_s25, 0  ;;  %s827_s9 = int_to_ptr.vmem [resolvable:$true] %s348_s9 }
  0x41   : > { %v215_v17 = vadd.f32 %v214_v15, %v213_v14  ;;  %s559_s28 = scalar_lea.vmem %s827_s9, 128  ;;  %s647_s24 = smov [#allocation5]  }
  0x42   : > { %p560_p8 = scmp.ne.s32.totalorder %s827_s9, %s559_s28  ;;  %s563_s29 = sshll.u32 %s647_s24, 4  ;;  %s564_s29 = int_to_ptr.vmem [resolvable:$false] %s563_s29 }
  0x43   : > { %v217_v19 = vadd.f32 %v216_v18, %v215_v17  ;;  %s565_s30 = scalar_lea.vmem %s564_s29, 256  ;;  %p566_p6 = scmp.lt.s32.totalorder %s827_s9, %s564_s29 }
  0x44   : > { %314 = vperm.xlu1 %526, %v448_v5   ;;  %310 = vperm.xlu0 %525, %v447_v6   ;;  %p561_p11 = pnand %p560_p8, %p892_p9  ;;  %p567_p13 = scmp.lt.s32.totalorder %s565_s30, %s559_s28 }
  0x45   : > { %v218_v20 = vmul.f32 0.25, %v217_v19 }
  0x46   : > { %p562_p0 = pneg %p561_p11  ;;  %p568_p2 = por %p567_p13, %p566_p6 }
  0x47   : > { %v219_v21 = vsub.f32 %v206_v9, %v218_v20  ;;  %v220_v22 = vsub.f32 %v207_v10, %v218_v20  ;;  %v221_v23 = vsub.f32 %v208_v13, %v218_v20  ;;  %v222_v26 = vsub.f32 %v209_v16, %v218_v20 }
  0x48   : > { %322 = vperm.xlu1 %526, %v450_v7   ;;  %318 = vperm.xlu0 %525, %v449_v8   ;;  %p569_p5 = pnand %p568_p2, %p562_p0 }
  0x49   : > { %v223_v24 = vmul.f32 %v219_v21, %v219_v21  ;;  %v224_v25 = vmul.f32 %v220_v22, %v220_v22  ;;  %v225_v27 = vmul.f32 %v221_v23, %v221_v23  ;;  %v226_v31 = vmul.f32 %v222_v26, %v222_v26 }
  0x4b   : > { %v227_v28 = vsel %vm210_vm0, %v223_v24, 0.0  ;;  %v228_v29 = vsel %vm210_vm0, %v224_v25, 0.0  ;;  %v230_v32 = vsel %vm210_vm0, %v225_v27, 0.0  ;;  %v232_v34 = vsel %vm210_vm0, %v226_v31, 0.0 }
  0x4c   : > { %v229_v30 = vadd.f32 %v228_v29, %v227_v28 }
  0x4e   : > { %v231_v33 = vadd.f32 %v230_v32, %v229_v30 }
  0x50   : > { %v233_v35 = vadd.f32 %v232_v34, %v231_v33 }
  0x52   : > { %v234_v36 = vmul.f32 0.25, %v233_v35 }
  0x54   : > { %v235_v37 = vadd.f32 1e-06, %v234_v36 }
  0x56   : > { %527 = vrsqrt.f32 %v235_v37 }
  0x60   : > { %v528_v38 = vpop.eup %527 }
  0x61   : > { %v237_v41 = vmul.f32 %v528_v38, %v219_v21  ;;  %v238_v42 = vmul.f32 %v528_v38, %v220_v22  ;;  %v239_v45 = vmul.f32 %v528_v38, %v221_v23  ;;  %v240_v47 = vmul.f32 %v528_v38, %v222_v26 }
  0xbb   : > { %v275_v39 = vpop.permute.xlu1 %274  ;;  %v267_v40 = vpop.permute.xlu0 %266 }
  0xbc   : > { %v281_v46 = vmul.f32 %v267_v40, %v237_v41  ;;  %v283_v53 = vmul.f32 %v275_v39, %v239_v45 }
  0xbf   : > { %v279_v43 = vpop.permute.xlu1 %278  ;;  %v271_v44 = vpop.permute.xlu0 %270 }
  0xc0   : > { %v282_v48 = vmul.f32 %v271_v44, %v238_v42  ;;  %v284_v54 = vmul.f32 %v279_v43, %v240_v47 }
  0xc3   : > { %v315_v49 = vpop.permute.xlu1 %314  ;;  %v311_v50 = vpop.permute.xlu0 %310 }
  0xc4   : > { %v326_v51 = vadd.f32 %v315_v49, %v282_v48  ;;  %v325_v52 = vadd.f32 %v311_v50, %v281_v46 }
  0xc6   : > { %330 = vst [vmem:[%s205_s21 + $0x2] sm:$0x3] %v326_v51  ;;  %329 = vst [vmem:[%s205_s21] sm:$0x3] %v325_v52 }
  0xc7   : > { %v323_v55 = vpop.permute.xlu1 %322  ;;  %v319_v56 = vpop.permute.xlu0 %318 }
  0xc8   : > { %v328_v57 = vadd.f32 %v323_v55, %v284_v54  ;;  %v327_v58 = vadd.f32 %v319_v56, %v283_v53 }
  0xca   : > { %332 = vst [vmem:[%s205_s21 + $0x6] sm:$0x3] %v328_v57  ;;  %331 = vst [vmem:[%s205_s21 + $0x4] sm:$0x3] %v327_v58 }
  0xcb   : > { %572 = shalt.err (!%p569_p5)
}
  0xcc   : > { %s573_s4 = scalar_lea.hbm %s832_s23, 128  ;;  %s577_s19 = scalar_lea.hbm %s884_s3, 256 }
  0xcd   : > { %p574_p4 = scmp.ne.s32.totalorder %s832_s23, %s573_s4  ;;  %p578_p12 = scmp.lt.u32.totalorder %s832_s23, %s884_s3 }
  0xce   : > { %p579_p1 = scmp.lt.u32.totalorder %s577_s19, %s573_s4  ;;  %p581_p8 = scmp.lt.u32.totalorder %s573_s4, %s832_s23 }
  0xcf   : > { %p575_p7 = pnand %p574_p4, %p892_p9 }
  0xd0   : > { %p580_p3 = por %p579_p1, %p578_p12 }
  0xd1   : > { %p576_p10 = pneg %p575_p7 }
  0xd2   : > { %p582_p11 = por %p581_p8, %p580_p3 }
  0xd4   : > { %p583_p0 = pnand %p582_p11, %p576_p10 }
  0xd6   : > { %586 = shalt.err (!%p583_p0)
}
  0xd7   : > { %s648_s21 = smov 32   ;;  %s649_s10 = smov 2  }
  0xd8   : > { %460 = dma.vmem_to_hbm [thread:$0]  (%p892_p9), %s827_s9, 128, %s832_s23, %s334_s15, %s648_s21, %s648_s21, %s649_s10  }
  0xd9 PF: > { %s363_s18 = sand.u32 1, %s621_s12   ;;  %p893_p6 = scmp.ne.s32.totalorder %s889_s27, 0 }
  0xda   : > { %p894_p13 = scmp.ge.s32.totalorder %s641_s17, 2  ;;  %s364_s22 = scalar_lea.sflag [#allocation4], %s363_s18 }
  0xdc   : > { %p467_p2 = pnand %p894_p13, %p893_p6 }
  0xde   : > { %616 = dma.done.wait (!%p467_p2), %s364_s22, 128  }
  0xdf   : > { %618 = vsyncadd (!%p467_p2), %s364_s22, 4294967168  ;;  %s19_s17 = sadd.s32 1, %s641_s17   ;;  %s895_s12 = smov %s625_s13 }
  0xe0   : > { %p16_p5 = scmp.ge.s32.totalorder %s19_s17, 4   ;;  %s896_s13 = smov %s629_s14 }
  0xe1   : > { %s897_s14 = smov %s726_s26  ;;  %s898_s15 = smov %s637_s16 }
  0xe2   : > { %s899_s16 = smov %s901_s20  ;;  %18 = sbr.rel (!%p16_p5) target bundleno = 6 (0x6), region = 77 }
  0xe9   :  { %369 = vsyncpa [#allocation3], 1 }
  0xea   :  { %371 = vsyncpa [#allocation3 + $0x1], 1 }
  0xeb   :  { %372 = vsyncpa [#allocation4], 1 }
  0xec   :  { %374 = vsyncpa [#allocation4 + $0x1], 1 }

</bundles_post_ra>
